<compile_context>
chip_gen: v6e
topology: v6e:2x2x1
jax: 0.10.0
libtpu: 0.0.40
codegen_flags: <defaults>
</compile_context>

<pallas_src>
import jax
import jax.numpy as jnp
from jax.experimental import pallas as pl
from jax.experimental.pallas import tpu as pltpu

_EPS = 1e-6     # same small_value as the PyTorch reference
_BETA2 = 4.0    # beta = 2  ->  beta^2 = 4


# --------------------------------------------------------------------------- utilities
def _sublane_multiple(itemsize):
    # Minimum second-to-last tile dim for packed dtypes: f32 -> 8, bf16 -> 16, int8 -> 32.
    return {4: 8, 2: 16, 1: 32}.get(int(itemsize), 8)


def _tpu_vmem_capacity_bytes():
    try:
        info = pltpu.get_tpu_info()
        cap = getattr(info, "vmem_capacity_bytes", None)
        if isinstance(cap, int) and cap > 0:
            return cap
    except Exception:
        pass
    return 128 * 1024 * 1024  # v5e / v6e default


def _num_tensorcores():
    try:
        info = pltpu.get_tpu_info()
        for attr in ("num_cores", "num_tensorcores", "core_count", "tensorcore_count"):
            v = getattr(info, attr, None)
            if isinstance(v, int) and v > 0:
                return v
    except Exception:
        pass
    try:
        kind = jax.devices()[0].device_kind.lower()
        if "v7" in kind or "tpu7" in kind or "7x" in kind:
            return 2  # v7x: 2 TensorCores per chip
    except Exception:
        pass
    return 1  # v5e / v6e: 1 TensorCore per chip


def _vmem_plan():
    cap = _tpu_vmem_capacity_bytes()
    if cap <= 64 * 1024 * 1024:
        limit = 36 * 1024 * 1024   # 64-MiB-VMEM chips (v7x): stay well under physical
    else:
        limit = 80 * 1024 * 1024   # 128-MiB chips (v5e / v6e): go wide
    budget = (3 * limit) // 4      # tile-picking budget consistent with the limit passed
    return limit, budget


def _pick_tile_rows(batch, n_classes, it_x, it_y, budget_bytes, mult):
    # Per row of the tile: 2 pipeline buffers per input at the native dtype, plus ~8 live
    # full-tile f32 temporaries (x, y, p, bce_elem, mod, products) Mosaic may materialize.
    per_row = n_classes * (2 * (it_x + it_y) + 8 * 4)
    tb = budget_bytes // max(per_row, 1)
    if tb >= batch:
        return batch
    return int(max(mult, (tb // mult) * mult))


# ------------------------------------------------------------------------------ kernel
def _make_kernel(batch, n_classes, tile_rows, blocks_per_core, ncore, needs_mask,
                 hard_labels):
    # Static weights of the affine combination -- GLOBAL normalizers, not per-tile.
    w_bce = 0.45 / (batch * n_classes)
    w_fs = 0.45 / batch
    w_focal = 0.1 / batch

    def kernel(logits_ref, labels_ref, out_ref):
        if ncore > 1:
            c = pl.program_id(0)
            b = pl.program_id(1)
            g = c * blocks_per_core + b        # global (unclamped) row-tile index
        else:
            b = pl.program_id(0)
            g = b

        @pl.when(b == 0)
        def _init():
            out_ref[...] = jnp.zeros_like(out_ref)

        x = logits_ref[...].astype(jnp.float32)   # (TB, C)  (bf16 inputs OK: cast here)
        y = labels_ref[...].astype(jnp.float32)   # (TB, C)

        # ---------------- Fbeta(beta=2): per-row soft F-score ----------------
        p = jax.nn.sigmoid(x)
        num_pos = jnp.sum(p, axis=1, keepdims=True) + _EPS          # (TB, 1)
        num_pos_hat = jnp.sum(y, axis=1, keepdims=True) + _EPS      # (TB, 1)
        tp = jnp.sum(y * p, axis=1, keepdims=True)                  # (TB, 1)
        precise = tp / num_pos
        recall = tp / num_pos_hat
        fs = (1.0 + _BETA2) * precise * recall / (_BETA2 * precise + recall + _EPS)

        # ---------------- BCE with logits (stable, == PyTorch formula) -------
        # x - x*y + max(-x,0) + log(exp(-max)+exp(-x-max)) == max(x,0) - x*y + softplus(-|x|)
        # softplus(-|x|) == -log(sigmoid(|x|)) == -log(where(x>=0, p, 1-p)): reuses p,
        # one EUP log per element instead of exp + log1p.
        bce_elem = (jnp.maximum(x, 0.0) - x * y
                    - jnp.log(jnp.where(x >= 0.0, p, 1.0 - p)))
        bce_rows = jnp.sum(bce_elem, axis=1, keepdims=True)          # (TB, 1)

        # ---------------- Focal(gamma=2) --------------------------------------
        # exp(2*logsigmoid(z)) == sigmoid(z)**2 with z = -x*(2y-1).
        if hard_labels:
            # For y in {0,1}: sigmoid(-x*(2y-1)) == where(y==1, 1-p, p) == p + y - 2*p*y
            # (VPU-only; no second sigmoid on the EUP).
            mod = p + y - 2.0 * p * y
        else:
            mod = jax.nn.sigmoid(-x * (2.0 * y - 1.0))
        focal_rows = jnp.sum(mod * mod * bce_elem, axis=1, keepdims=True)  # (TB, 1)

        # Per-row contribution to the global loss.
        comb = w_bce * bce_rows + w_focal * focal_rows - w_fs * fs   # (TB, 1)

        if needs_mask:
            # Only tiles that overrun the batch pay the iota/compare/select; all other
            # grid steps take the cheap unmasked accumulate.
            in_bounds = (g + 1) * tile_rows <= batch

            @pl.when(in_bounds)
            def _acc_full():
                out_ref[...] += jnp.sum(comb)

            @pl.when(jnp.logical_not(in_bounds))
            def _acc_masked():
                row0 = g * tile_rows
                row = row0 + jax.lax.broadcasted_iota(jnp.int32, comb.shape, 0)
                # NOTE: must stay a select (jnp.where), NOT a multiply -- padded rows can
                # hold NaN/Inf from out-of-range reads and a multiply would propagate them.
                out_ref[...] += jnp.sum(jnp.where(row < batch, comb, 0.0))
        else:
            out_ref[...] += jnp.sum(comb)   # scalar splat-accumulated into (1,8,128)

    return kernel


# ----------------------------------------------------------------------------- wrapper
def bce_fbeta_focal_loss(logits, labels, *, tile_rows=None, hard_labels=False,
                         num_cores=None, vmem_limit_bytes=None):
    assert logits.ndim == 2 and logits.shape == labels.shape
    batch, n_classes = logits.shape
    it_x = jnp.dtype(logits.dtype).itemsize
    it_y = jnp.dtype(labels.dtype).itemsize
    mult = max(_sublane_multiple(it_x), _sublane_multiple(it_y))

    limit, budget = _vmem_plan()
    if vmem_limit_bytes is not None:
        limit = int(vmem_limit_bytes)
        budget = (3 * limit) // 4

    if tile_rows is None:
        tile_rows = _pick_tile_rows(batch, n_classes, it_x, it_y, budget, mult)
    tile_rows = int(min(tile_rows, batch))
    if tile_rows < batch:
        # sublane-aligned to the packed-dtype minimum unless the tile is the full batch
        tile_rows = max(mult, (tile_rows // mult) * mult)

    total_tiles = pl.cdiv(batch, tile_rows)
    ncore = _num_tensorcores() if num_cores is None else int(num_cores)
    ncore = max(1, min(ncore, total_tiles))

    def run(ncore_):
        blocks_per_core = pl.cdiv(total_tiles, ncore_)
        needs_mask = (ncore_ * blocks_per_core * tile_rows) != batch
        kernel = _make_kernel(batch, n_classes, tile_rows, blocks_per_core,
                              ncore_, needs_mask, hard_labels)

        if ncore_ > 1:
            grid = (ncore_, blocks_per_core)

            def in_map(c, b):
                g = c * blocks_per_core + b
                # Clamp padded tail tiles to the last valid block; the in-kernel row
                # mask zeroes their contribution, so uneven core splits are allowed.
                return (jnp.minimum(g, total_tiles - 1), 0)

            out_map = lambda c, b: (c, 0, 0)
            semantics = (pltpu.CORE_PARALLEL, pltpu.ARBITRARY)
        else:
            grid = (total_tiles,)
            in_map = lambda b: (b, 0)
            out_map = lambda b: (0, 0, 0)
            semantics = ("arbitrary",)

        partials = pl.pallas_call(
            kernel,
            out_shape=jax.ShapeDtypeStruct((ncore_, 8, 128), jnp.float32),
            grid=grid,
            in_specs=[
                pl.BlockSpec((tile_rows, n_classes), in_map),
                pl.BlockSpec((tile_rows, n_classes), in_map),
            ],
            out_specs=pl.BlockSpec((1, 8, 128), out_map),
            compiler_params=pltpu.CompilerParams(
                dimension_semantics=semantics,
                vmem_limit_bytes=int(limit),
            ),
        )(logits, labels)

        # Each core's partial is splatted across its (8,128) block; combine and add the
        # constant 0.45 from the Fbeta term (loss = 0.45*bce + 0.45*(1 - fs/B) + 0.1*focal).
        return 0.45 + jnp.sum(partials[:, 0, 0])

    if ncore == 1:
        return run(1)
    try:
        return run(ncore)          # CORE_PARALLEL path on multi-TensorCore chips
    except Exception:
        return run(1)              # safety net: single-core grid always lowers


# --------------------------------------------------------------------------- reference
def _reference_loss(logits, labels):
    """Pure-JAX mirror of the PyTorch BCEFbetaFocalLoss (written the 'original' way)."""
    x = logits.astype(jnp.float32)
    y = labels.astype(jnp.float32)
    batch = x.shape[0]
    eps = 1e-6
    p = jax.nn.sigmoid(x)
    num_pos = jnp.sum(p, axis=1) + eps
    num_pos_hat = jnp.sum(y, axis=1) + eps
    tp = jnp.sum(y * p, axis=1)
    precise = tp / num_pos
    recall = tp / num_pos_hat
    fs = 5.0 * precise * recall / (4.0 * precise + recall + eps)
    f1 = 1.0 - jnp.sum(fs) / batch
    max_val = jnp.maximum(-x, 0.0)
    bce_elem = x - x * y + max_val + jnp.log(jnp.exp(-max_val) + jnp.exp(-x - max_val))
    bce = jnp.mean(bce_elem)
    invprobs = jax.nn.log_sigmoid(-x * (y * 2.0 - 1.0))
    focal = jnp.mean(jnp.sum(jnp.exp(invprobs * 2.0) * bce_elem, axis=1))
    return 0.45 * bce + 0.45 * f1 + 0.1 * focal


if __name__ == "__main__":
    key = jax.random.PRNGKey(0)
    k1, k2, k3, k4 = jax.random.split(key, 4)

    checks = []

    # Case 1: small lane-aligned problem, hard {0,1} labels -> VPU-only focal modulator.
    b1, c1 = 32, 128
    x1 = jax.random.normal(k1, (b1, c1), dtype=jnp.float32)
    y1 = jax.random.bernoulli(k2, 0.3, (b1, c1)).astype(jnp.float32)
    checks.append((bce_fbeta_focal_loss(x1, y1, hard_labels=True),
                   _reference_loss(x1, y1)))

    # Case 2: same data, generic soft-label path + forced small tiles (accumulator grid).
    checks.append((bce_fbeta_focal_loss(x1, y1, tile_rows=8),
                   _reference_loss(x1, y1)))

    # Case 3: ragged batch + soft labels -> exercises the masked final tile
    # (and the uneven CORE_PARALLEL split on multi-TensorCore chips).
    b3, c3 = 20, 128
    x3 = jax.random.normal(k3, (b3, c3), dtype=jnp.float32)
    y3 = jax.random.uniform(k4, (b3, c3), dtype=jnp.float32)
    checks.append((bce_fbeta_focal_loss(x3, y3, tile_rows=8),
                   _reference_loss(x3, y3)))

    # Case 4: bf16 inputs -> 16-row sublane alignment path, in-kernel f32 cast.
    x4 = x1.astype(jnp.bfloat16)
    y4 = y1.astype(jnp.bfloat16)
    checks.append((bce_fbeta_focal_loss(x4, y4, hard_labels=True, tile_rows=16),
                   _reference_loss(x4, y4)))

    got = jax.block_until_ready([c[0] for c in checks])
    for g, (_, ref) in zip(got, checks):
        assert jnp.allclose(g, ref, rtol=1e-4, atol=1e-5), (g, ref)
    print("KERNEL_OK")
</pallas_src>

<mosaic_0001>
module attributes {stable_mosaic.version = 11 : i64} {
  func.func @kernel(%arg0: i32, %arg1: memref<32x128xf32, #tpu.memory_space<vmem>>, %arg2: memref<32x128xf32, #tpu.memory_space<vmem>>, %arg3: memref<1x8x128xf32, #tpu.memory_space<vmem>>) attributes {dimension_semantics = [#tpu.dimension_semantics<arbitrary>], iteration_bounds = array<i64: 1>, scalar_prefetch = 0 : i64, scratch_operands = 0 : i64, tpu.core_type = #tpu.core_type<tc>, window_params = [{transform_indices = @transform_0, window_bounds = array<i64: 32, 128>}, {transform_indices = @transform_1, window_bounds = array<i64: 32, 128>}, {pipeline_mode = #tpu.pipeline_mode<synchronous>, transform_indices = @transform_2, window_bounds = array<i64: 1, 8, 128>}]} {
    %c0_i32 = arith.constant 0 : i32
    %0 = arith.cmpi eq, %arg0, %c0_i32 : i32
    %1 = arith.extui %0 : i1 to i32
    %c0_i32_0 = arith.constant 0 : i32
    %2 = arith.cmpi ne, %1, %c0_i32_0 : i32
    scf.if %2 {
      %cst_28 = arith.constant 0.000000e+00 : f32
      %70 = vector.broadcast %cst_28 : f32 to vector<1x8x128xf32>
      %c0_29 = arith.constant 0 : index
      %c0_30 = arith.constant 0 : index
      %c0_31 = arith.constant 0 : index
      %71 = vector.load %arg3[%c0_29, %c0_30, %c0_31] : memref<1x8x128xf32, #tpu.memory_space<vmem>>, vector<1x8x128xf32>
      tpu.vector_store %arg3[%c0_29, %c0_30, %c0_31], %70 {strides = array<i32>} : memref<1x8x128xf32, #tpu.memory_space<vmem>>, vector<1x8x128xf32>,
    } else {
    }
    %c0 = arith.constant 0 : index
    %c0_1 = arith.constant 0 : index
    %3 = vector.load %arg1[%c0, %c0_1] : memref<32x128xf32, #tpu.memory_space<vmem>>, vector<32x128xf32>
    %c0_2 = arith.constant 0 : index
    %c0_3 = arith.constant 0 : index
    %4 = vector.load %arg2[%c0_2, %c0_3] : memref<32x128xf32, #tpu.memory_space<vmem>>, vector<32x128xf32>
    %5 = arith.negf %3 : vector<32x128xf32>
    %6 = math.exp %5 : vector<32x128xf32>
    %cst = arith.constant 1.000000e+00 : f32
    %7 = vector.broadcast %cst : f32 to vector<32x128xf32>
    %8 = arith.addf %7, %6 : vector<32x128xf32>
    %9 = arith.divf %7, %8 : vector<32x128xf32>
    %cst_4 = arith.constant dense<0.000000e+00> : vector<32xf32>
    %10 = vector.multi_reduction <add>, %9, %cst_4 [1] : vector<32x128xf32> to vector<32xf32>
    %11 = vector.shape_cast %10 : vector<32xf32> to vector<32x1xf32>
    %cst_5 = arith.constant 9.99999997E-7 : f32
    %12 = vector.broadcast %cst_5 : f32 to vector<32x1xf32>
    %13 = arith.addf %11, %12 : vector<32x1xf32>
    %cst_6 = arith.constant dense<0.000000e+00> : vector<32xf32>
    %14 = vector.multi_reduction <add>, %4, %cst_6 [1] : vector<32x128xf32> to vector<32xf32>
    %15 = vector.shape_cast %14 : vector<32xf32> to vector<32x1xf32>
    %cst_7 = arith.constant 9.99999997E-7 : f32
    %16 = vector.broadcast %cst_7 : f32 to vector<32x1xf32>
    %17 = arith.addf %15, %16 : vector<32x1xf32>
    %18 = arith.mulf %4, %9 : vector<32x128xf32>
    %cst_8 = arith.constant dense<0.000000e+00> : vector<32xf32>
    %19 = vector.multi_reduction <add>, %18, %cst_8 [1] : vector<32x128xf32> to vector<32xf32>
    %20 = vector.shape_cast %19 : vector<32xf32> to vector<32x1xf32>
    %21 = arith.divf %20, %13 : vector<32x1xf32>
    %22 = arith.divf %20, %17 : vector<32x1xf32>
    %cst_9 = arith.constant 5.000000e+00 : f32
    %23 = vector.broadcast %cst_9 : f32 to vector<32x1xf32>
    %24 = arith.mulf %23, %21 : vector<32x1xf32>
    %25 = arith.mulf %24, %22 : vector<32x1xf32>
    %cst_10 = arith.constant 4.000000e+00 : f32
    %26 = vector.broadcast %cst_10 : f32 to vector<32x1xf32>
    %27 = arith.mulf %26, %21 : vector<32x1xf32>
    %28 = arith.addf %27, %22 : vector<32x1xf32>
    %cst_11 = arith.constant 9.99999997E-7 : f32
    %29 = vector.broadcast %cst_11 : f32 to vector<32x1xf32>
    %30 = arith.addf %28, %29 : vector<32x1xf32>
    %31 = arith.divf %25, %30 : vector<32x1xf32>
    %cst_12 = arith.constant 0.000000e+00 : f32
    %32 = vector.broadcast %cst_12 : f32 to vector<32x128xf32>
    %33 = arith.maximumf %3, %32 : vector<32x128xf32>
    %34 = arith.mulf %3, %4 : vector<32x128xf32>
    %35 = arith.subf %33, %34 : vector<32x128xf32>
    %cst_13 = arith.constant 0.000000e+00 : f32
    %36 = vector.broadcast %cst_13 : f32 to vector<32x128xf32>
    %37 = arith.cmpf oge, %3, %36 : vector<32x128xf32>
    %cst_14 = arith.constant 1.000000e+00 : f32
    %38 = vector.broadcast %cst_14 : f32 to vector<32x128xf32>
    %39 = arith.subf %38, %9 : vector<32x128xf32>
    %40 = arith.select %37, %9, %39 : vector<32x128xi1>, vector<32x128xf32>
    %41 = math.log %40 : vector<32x128xf32>
    %42 = arith.subf %35, %41 : vector<32x128xf32>
    %cst_15 = arith.constant dense<0.000000e+00> : vector<32xf32>
    %43 = vector.multi_reduction <add>, %42, %cst_15 [1] : vector<32x128xf32> to vector<32xf32>
    %44 = vector.shape_cast %43 : vector<32xf32> to vector<32x1xf32>
    %45 = arith.addf %9, %4 : vector<32x128xf32>
    %cst_16 = arith.constant 2.000000e+00 : f32
    %46 = vector.broadcast %cst_16 : f32 to vector<32x128xf32>
    %47 = arith.mulf %46, %9 : vector<32x128xf32>
    %48 = arith.mulf %47, %4 : vector<32x128xf32>
    %49 = arith.subf %45, %48 : vector<32x128xf32>
    %50 = arith.mulf %49, %49 : vector<32x128xf32>
    %51 = arith.mulf %50, %42 : vector<32x128xf32>
    %cst_17 = arith.constant dense<0.000000e+00> : vector<32xf32>
    %52 = vector.multi_reduction <add>, %51, %cst_17 [1] : vector<32x128xf32> to vector<32xf32>
    %53 = vector.shape_cast %52 : vector<32xf32> to vector<32x1xf32>
    %cst_18 = arith.constant 1.09863278E-4 : f32
    %54 = vector.broadcast %cst_18 : f32 to vector<32x1xf32>
    %55 = arith.mulf %54, %44 : vector<32x1xf32>
    %cst_19 = arith.constant 3.125000e-03 : f32
    %56 = vector.broadcast %cst_19 : f32 to vector<32x1xf32>
    %57 = arith.mulf %56, %53 : vector<32x1xf32>
    %58 = arith.addf %55, %57 : vector<32x1xf32>
    %cst_20 = arith.constant 1.406250e-02 : f32
    %59 = vector.broadcast %cst_20 : f32 to vector<32x1xf32>
    %60 = arith.mulf %59, %31 : vector<32x1xf32>
    %61 = arith.subf %58, %60 : vector<32x1xf32>
    %c0_21 = arith.constant 0 : index
    %c0_22 = arith.constant 0 : index
    %c0_23 = arith.constant 0 : index
    %62 = vector.load %arg3[%c0_21, %c0_22, %c0_23] : memref<1x8x128xf32, #tpu.memory_space<vmem>>, vector<1x8x128xf32>
    %63 = vector.shape_cast %61 : vector<32x1xf32> to vector<1x32x1xf32>
    %cst_24 = arith.constant dense<0.000000e+00> : vector<1xf32>
    %64 = vector.multi_reduction <add>, %63, %cst_24 [1, 2] : vector<1x32x1xf32> to vector<1xf32>
    %65 = vector.shape_cast %64 : vector<1xf32> to vector<1x1x1xf32>
    %66 = vector.extract %65[0, 0, 0] : f32 from vector<1x1x1xf32>
    %67 = vector.broadcast %66 : f32 to vector<1x8x128xf32>
    %68 = arith.addf %62, %67 : vector<1x8x128xf32>
    %c0_25 = arith.constant 0 : index
    %c0_26 = arith.constant 0 : index
    %c0_27 = arith.constant 0 : index
    %69 = vector.load %arg3[%c0_25, %c0_26, %c0_27] : memref<1x8x128xf32, #tpu.memory_space<vmem>>, vector<1x8x128xf32>
    tpu.vector_store %arg3[%c0_25, %c0_26, %c0_27], %68 {strides = array<i32>} : memref<1x8x128xf32, #tpu.memory_space<vmem>>, vector<1x8x128xf32>,
    return
  }
  func.func @transform_0(%arg0: i32) -> (i32, i32) {
    %c0_i32 = arith.constant 0 : i32
    %c0_i32_0 = arith.constant 0 : i32
    return %arg0, %c0_i32 : i32, i32
  }
  func.func @transform_1(%arg0: i32) -> (i32, i32) {
    %c0_i32 = arith.constant 0 : i32
    %c0_i32_0 = arith.constant 0 : i32
    return %arg0, %c0_i32 : i32, i32
  }
  func.func @transform_2(%arg0: i32) -> (i32, i32, i32) {
    %c0_i32 = arith.constant 0 : i32
    %c0_i32_0 = arith.constant 0 : i32
    %c0_i32_1 = arith.constant 0 : i32
    %c0_i32_2 = arith.constant 0 : i32
    return %c0_i32, %c0_i32_0, %c0_i32_1 : i32, i32, i32
  }
}

</mosaic_0001>

<bundles_post_ra>
// kernel: tpu_custom_call.1
= control target key start
LH: loop header
LB: loop body
LE: loop exit
PB: predicated region body
PF: predicated region fallthrough
CT: control target
= control target key end

     0   :  { %7 = vsyncpa [#allocation3], 0  ;;  %s483_s0 = inlined_call_operand.hbm [shape: f32[32,128], index: 0, kind: input, shape index: {}]   ;;  %s484_s1 = inlined_call_operand.hbm [shape: f32[32,128], index: 1, kind: input, shape index: {}]   ;;  %s485_s2 = inlined_call_operand.hbm [shape: f32[1,8,128], index: 2, kind: output, shape index: {}]  }
   0x1   :  { %8 = vsyncpa [#allocation6], 0 }
   0x2   :  { %9 = vsyncpa [#allocation4], 0  ;;  %s416_s9 = smov [#allocation2]  }
   0x3   :  { %s15_s10 = sshll.u32 %s416_s9, 4  ;;  %s16_s10 = int_to_ptr.vmem [resolvable:$true] %s15_s10 }
   0x4   :  { %s358_s11 = scalar_lea.vmem %s16_s10, 512  ;;  %p363_p1 = scmp.lt.s32.totalorder %s16_s10, %s16_s10 }
   0x5   :  { %p359_p0 = scmp.ne.s32.totalorder %s16_s10, %s358_s11  ;;  %p364_p2 = scmp.lt.s32.totalorder %s358_s11, %s358_s11 }
   0x7   :  { %p365_p3 = por %p364_p2, %p363_p1 }
   0x9   :  { %p366_p4 = pnand %p365_p3, %p359_p0 }
   0xb   :  { %369 = shalt.err (!%p366_p4)
}
   0xc   :  { %s417_s12 = smov 128   ;;  %s418_s13 = smov 8  }
   0xd   :  { %21 = dma.hbm_to_vmem [thread:$0]  %s483_s0, 512, %s16_s10, [#allocation3], %s417_s12, %s417_s12, %s418_s13  }
   0xe   :  { %s419_s16 = smov [#allocation5]  }
   0xf   :  { %s27_s17 = sshll.u32 %s419_s16, 4  ;;  %s28_s17 = int_to_ptr.vmem [resolvable:$true] %s27_s17 }
  0x10   :  { %s378_s18 = scalar_lea.vmem %s28_s17, 512  ;;  %p383_p6 = scmp.lt.s32.totalorder %s28_s17, %s28_s17 }
  0x11   :  { %p379_p5 = scmp.ne.s32.totalorder %s28_s17, %s378_s18  ;;  %p384_p7 = scmp.lt.s32.totalorder %s378_s18, %s378_s18 }
  0x13   :  { %p385_p8 = por %p384_p7, %p383_p6 }
  0x15   :  { %p386_p9 = pnand %p385_p8, %p379_p5 }
  0x17   :  { %389 = shalt.err (!%p386_p9)
}
  0x18   :  { %33 = dma.hbm_to_vmem [thread:$0]  %s484_s1, 512, %s28_s17, [#allocation6], %s417_s12, %s417_s12, %s418_s13  }
  0x19   :  { %410 = dma.done.wait [#allocation3], 512  }
  0x1a   :  { %411 = vsyncadd [#allocation3], 4294966784 }
  0x1b   :  { %412 = dma.done.wait [#allocation6], 512  }
  0x1c   :  { %413 = vsyncadd [#allocation6], 4294966784  ;;  %v442_v0 = vld [vmem:[#allocation5 + $0x8] sm:$0xff]  ;;  %v444_v1 = vld [vmem:[#allocation5] sm:$0xff]  ;;  %vm254_vm4 = vcmask 7168   ;;  %s420_s0 = smov [#allocation7]  }
  0x1d   :  { %v446_v2 = vld [vmem:[#allocation2 + $0x10] sm:$0xff]  ;;  %91 = vadd.xlane.f32.xlu0 %v442_v0  ;;  %89 = vadd.xlane.f32.xlu1 %v444_v1  ;;  %v451_v4 = vld [vmem:[#allocation2] sm:$0xff]  ;;  %v453_v5 = vld [vmem:[#allocation2 + $0x18] sm:$0xff]  ;;  %s280_s1 = sshll.u32 %s420_s0, 4  ;;  %s281_s1 = int_to_ptr.vmem [resolvable:$true] %s280_s1 }
  0x1e   :  { %v292_v3 = vmul.f32 -1.442695, %v446_v2  ;;  %v455_v6 = vld [vmem:[#allocation2 + $0x8] sm:$0xff]  ;;  %v290_v7 = vmul.f32 -1.442695, %v451_v4  ;;  %vm171_vm0 = vcmp.ge.f32.partialorder %v446_v2, 0.0  ;;  %v161_v36 = vmul.f32 %v444_v1, %v451_v4  ;;  %p395_p11 = scmp.lt.s32.totalorder %s281_s1, %s281_s1 }
  0x1f   :  { %v293_v8 = vmul.f32 -1.442695, %v453_v5  ;;  %v291_v9 = vmul.f32 -1.442695, %v455_v6  ;;  %vm169_vm1 = vcmp.ge.f32.partialorder %v451_v4, 0.0  ;;  %vm170_vm2 = vcmp.ge.f32.partialorder %v455_v6, 0.0 }
  0x20   :  { %302 = vpow2.f32 %v292_v3  ;;  %vm172_vm3 = vcmp.ge.f32.partialorder %v453_v5, 0.0  ;;  %v52_v28 = vld [vmem:[#allocation5 + $0x18] sm:$0xff]  ;;  %v51_v31 = vld [vmem:[#allocation5 + $0x10] sm:$0xff]  ;;  %v157_v39 = vmax.f32 %v451_v4, 0.0  ;;  %v158_v43 = vmax.f32 %v455_v6, 0.0  ;;  %s390_s22 = scalar_lea.vmem %s281_s1, 128 }
  0x21   :  { %304 = vpow2.f32 %v290_v7  ;;  %v162_v44 = vmul.f32 %v442_v0, %v455_v6  ;;  %v159_v45 = vmax.f32 %v446_v2, 0.0  ;;  %v163_v46 = vmul.f32 %v51_v31, %v446_v2  ;;  %p391_p10 = scmp.ne.s32.totalorder %s281_s1, %s390_s22  ;;  %p396_p12 = scmp.lt.s32.totalorder %s390_s22, %s390_s22 }
  0x22   :  { %306 = vpow2.f32 %v293_v8  ;;  %v165_v52 = vsub.f32 %v157_v39, %v161_v36  ;;  %v160_v63 = vmax.f32 %v453_v5, 0.0 }
  0x23   :  { %308 = vpow2.f32 %v291_v9  ;;  %v166_v56 = vsub.f32 %v158_v43, %v162_v44  ;;  %v167_v58 = vsub.f32 %v159_v45, %v163_v46  ;;  %p397_p13 = por %p396_p12, %p395_p11 }
  0x25   :  { %p398_p0 = pnand %p397_p13, %p391_p10 }
  0x2d   :  { %v303_v10 = vpop.eup %302 }
  0x2e   :  { %v305_v11 = vpop.eup %304  ;;  %v67_v12 = vadd.f32 1.0, %v303_v10 }
  0x2f   :  { %v307_v13 = vpop.eup %306  ;;  %v65_v14 = vadd.f32 1.0, %v305_v11 }
  0x30   :  { %v309_v15 = vpop.eup %308  ;;  %310 = vrcp.f32 %v67_v12  ;;  %v68_v16 = vadd.f32 1.0, %v307_v13 }
  0x31   :  { %312 = vrcp.f32 %v65_v14  ;;  %v66_v17 = vadd.f32 1.0, %v309_v15 }
  0x32   :  { %314 = vrcp.f32 %v68_v16 }
  0x33   :  { %316 = vrcp.f32 %v66_v17 }
  0x3d   :  { %v311_v18 = vpop.eup %310 }
  0x3e   :  { %v313_v19 = vpop.eup %312  ;;  %81 = vadd.xlane.f32.xlu1 %v311_v18  ;;  %v175_v20 = vsub.f32 1.0, %v311_v18  ;;  %v207_v37 = vmul.f32 2.0, %v311_v18  ;;  %v103_v42 = vmul.f32 %v311_v18, %v51_v31  ;;  %v203_v49 = vadd.f32 %v311_v18, %v51_v31 }
  0x3f   :  { %v315_v21 = vpop.eup %314  ;;  %77 = vadd.xlane.f32.xlu0 %v313_v19  ;;  %v173_v22 = vsub.f32 1.0, %v313_v19  ;;  %v101_v34 = vmul.f32 %v313_v19, %v444_v1  ;;  %v205_v35 = vmul.f32 2.0, %v313_v19  ;;  %v201_v47 = vadd.f32 %v313_v19, %v444_v1 }
  0x40   :  { %v317_v23 = vpop.eup %316  ;;  %v179_v24 = vsel %vm171_vm0, %v311_v18, %v175_v20  ;;  %v176_v25 = vsub.f32 1.0, %v315_v21  ;;  %v104_v38 = vmul.f32 %v315_v21, %v52_v28  ;;  %v211_v50 = vmul.f32 %v207_v37, %v51_v31 }
  0x41   :  { %v177_v26 = vsel %vm169_vm1, %v313_v19, %v173_v22  ;;  %v174_v27 = vsub.f32 1.0, %v317_v23  ;;  %318 = vlog2.f32 %v179_v24  ;;  %v102_v32 = vmul.f32 %v317_v23, %v442_v0 }
  0x42   :  { %83 = vadd.xlane.f32.xlu1 %v315_v21  ;;  %320 = vlog2.f32 %v177_v26  ;;  %v180_v30 = vsel %vm172_vm3, %v315_v21, %v176_v25  ;;  %v206_v33 = vmul.f32 2.0, %v317_v23  ;;  %v202_v40 = vadd.f32 %v317_v23, %v442_v0 }
  0x43   :  { %79 = vadd.xlane.f32.xlu0 %v317_v23  ;;  %v178_v29 = vsel %vm170_vm2, %v317_v23, %v174_v27  ;;  %v209_v48 = vmul.f32 %v205_v35, %v444_v1  ;;  %v208_v54 = vmul.f32 2.0, %v315_v21  ;;  %v215_v62 = vsub.f32 %v203_v49, %v211_v50 }
  0x44   :  { %322 = vlog2.f32 %v178_v29  ;;  %v210_v41 = vmul.f32 %v206_v33, %v442_v0  ;;  %v164_v0 = vmul.f32 %v52_v28, %v453_v5  ;;  %v204_v1 = vadd.f32 %v315_v21, %v52_v28 }
  0x45   :  { %324 = vlog2.f32 %v180_v30  ;;  %v213_v60 = vsub.f32 %v201_v47, %v209_v48  ;;  %v212_v6 = vmul.f32 %v208_v54, %v52_v28  ;;  %v219_v13 = vmul.f32 %v215_v62, %v215_v62 }
  0x46   :  { %95 = vadd.xlane.f32.xlu1 %v52_v28  ;;  %v214_v53 = vsub.f32 %v202_v40, %v210_v41  ;;  %v168_v11 = vsub.f32 %v160_v63, %v164_v0 }
  0x47   :  { %93 = vadd.xlane.f32.xlu0 %v51_v31  ;;  %v217_v10 = vmul.f32 %v213_v60, %v213_v60  ;;  %v216_v15 = vsub.f32 %v204_v1, %v212_v6 }
  0x48   :  { %v218_v4 = vmul.f32 %v214_v53, %v214_v53 }
  0x49   :  { %v220_v18 = vmul.f32 %v216_v15, %v216_v15 }
  0x4a   :  { %107 = vadd.xlane.f32.xlu1 %v102_v32 }
  0x4b   :  { %105 = vadd.xlane.f32.xlu0 %v101_v34 }
  0x4e   :  { %v319_v51 = vpop.eup %318  ;;  %111 = vadd.xlane.f32.xlu1 %v104_v38 }
  0x4f   :  { %v321_v55 = vpop.eup %320  ;;  %109 = vadd.xlane.f32.xlu0 %v103_v42  ;;  %v186_v59 = vmul.f32 0.6931472, %v319_v51 }
  0x50   :  { %v182_v57 = vmul.f32 0.6931472, %v321_v55 }
  0x51   :  { %v323_v61 = vpop.eup %322  ;;  %v191_v9 = vsub.f32 %v167_v58, %v186_v59 }
  0x52   :  { %v189_v2 = vsub.f32 %v165_v52, %v182_v57  ;;  %v184_v3 = vmul.f32 0.6931472, %v323_v61  ;;  %v325_v7 = vpop.eup %324 }
  0x53   :  { %v188_v14 = vmul.f32 0.6931472, %v325_v7  ;;  %v223_v5 = vmul.f32 %v219_v13, %v191_v9 }
  0x54   :  { %193 = vadd.xlane.f32.xlu0 %v189_v2  ;;  %v190_v8 = vsub.f32 %v166_v56, %v184_v3  ;;  %v221_v16 = vmul.f32 %v217_v10, %v189_v2 }
  0x55   :  { %v192_v17 = vsub.f32 %v168_v11, %v188_v14 }
  0x56   :  { %195 = vadd.xlane.f32.xlu1 %v190_v8  ;;  %v222_v12 = vmul.f32 %v218_v4, %v190_v8 }
  0x57   :  { %v224_v19 = vmul.f32 %v220_v18, %v192_v17 }
  0x58   :  { %197 = vadd.xlane.f32.xlu0 %v191_v9 }
  0x5a   :  { %227 = vadd.xlane.f32.xlu1 %v222_v12 }
  0x5c   :  { %225 = vadd.xlane.f32.xlu0 %v221_v16 }
  0x5e   :  { %229 = vadd.xlane.f32.xlu1 %v223_v5 }
  0x60   :  { %199 = vadd.xlane.f32.xlu0 %v192_v17 }
  0x62   :  { %231 = vadd.xlane.f32.xlu1 %v224_v19 }
  0xa6   :  { %v90_v20 = vpop.xlane.xlu1 %89  ;;  %v92_v21 = vpop.xlane.xlu0 %91 }
  0xa7   :  { %v97_v22 = vadd.f32 1e-06, %v90_v20  ;;  %v98_v24 = vadd.f32 1e-06, %v92_v21 }
  0xa9   :  { %326 = vrcp.f32 %v97_v22 }
  0xb6   :  { %v327_v38 = vpop.eup %326 }
  0xc7   :  { %v82_v23 = vpop.xlane.xlu1 %81 }
  0xc8   :  { %v78_v25 = vpop.xlane.xlu0 %77  ;;  %v87_v26 = vadd.f32 1e-06, %v82_v23 }
  0xc9   :  { %v85_v27 = vadd.f32 1e-06, %v78_v25 }
  0xcb   :  { %328 = vrcp.f32 %v85_v27  ;;  %v84_v28 = vpop.xlane.xlu1 %83 }
  0xcc   :  { %330 = vrcp.f32 %v98_v24  ;;  %v88_v29 = vadd.f32 1e-06, %v84_v28  ;;  %v80_v30 = vpop.xlane.xlu0 %79 }
  0xcd   :  { %332 = vrcp.f32 %v87_v26  ;;  %v86_v31 = vadd.f32 1e-06, %v80_v30 }
  0xce   :  { %334 = vrcp.f32 %v88_v29 }
  0xcf   :  { %336 = vrcp.f32 %v86_v31  ;;  %v96_v32 = vpop.xlane.xlu1 %95 }
  0xd0   :  { %v100_v33 = vadd.f32 1e-06, %v96_v32  ;;  %v94_v34 = vpop.xlane.xlu0 %93 }
  0xd1   :  { %v99_v35 = vadd.f32 1e-06, %v94_v34 }
  0xd2   :  { %338 = vrcp.f32 %v100_v33 }
  0xd3   :  { %340 = vrcp.f32 %v99_v35  ;;  %v108_v37 = vpop.xlane.xlu1 %107 }
  0xd4   :  { %v106_v36 = vpop.xlane.xlu0 %105 }
  0xd5   :  { %v122_v46 = vmul.f32 %v327_v38, %v106_v36 }
  0xd7   :  { %v112_v42 = vpop.xlane.xlu1 %111 }
  0xd8   :  { %v329_v39 = vpop.eup %328  ;;  %v110_v44 = vpop.xlane.xlu0 %109 }
  0xd9   :  { %v331_v40 = vpop.eup %330  ;;  %v114_v41 = vmul.f32 %v329_v39, %v106_v36 }
  0xda   :  { %v333_v43 = vpop.eup %332  ;;  %v124_v56 = vmul.f32 %v331_v40, %v108_v37 }
  0xdb   :  { %v335_v45 = vpop.eup %334  ;;  %v137_v47 = vmul.f32 4.0, %v114_v41  ;;  %v118_v52 = vmul.f32 %v333_v43, %v110_v44  ;;  %v129_v9 = vmul.f32 5.0, %v114_v41 }
  0xdc   :  { %v337_v48 = vpop.eup %336  ;;  %v120_v49 = vmul.f32 %v335_v45, %v112_v42 }
  0xdd   :  { %v116_v50 = vmul.f32 %v337_v48, %v108_v37  ;;  %v141_v51 = vadd.f32 %v137_v47, %v122_v46  ;;  %v194_v54 = vpop.xlane.xlu0 %193  ;;  %v139_v0 = vmul.f32 4.0, %v118_v52  ;;  %v133_v13 = vmul.f32 %v129_v9, %v122_v46 }
  0xde   :  { %v140_v53 = vmul.f32 4.0, %v120_v49  ;;  %v132_v15 = vmul.f32 5.0, %v120_v49  ;;  %v233_v18 = vmul.f32 0.00010986328, %v194_v54  ;;  %v131_v20 = vmul.f32 5.0, %v118_v52 }
  0xdf   :  { %v339_v55 = vpop.eup %338  ;;  %v138_v57 = vmul.f32 4.0, %v116_v50  ;;  %v145_v58 = vadd.f32 1e-06, %v141_v51  ;;  %v196_v59 = vpop.xlane.xlu1 %195  ;;  %v130_v12 = vmul.f32 5.0, %v116_v50 }
  0xe0   :  { %v341_v60 = vpop.eup %340  ;;  %v128_v61 = vmul.f32 %v339_v55, %v112_v42  ;;  %v234_v21 = vmul.f32 0.00010986328, %v196_v59 }
  0xe1   :  { %v142_v62 = vadd.f32 %v138_v57, %v124_v56  ;;  %342 = vrcp.f32 %v145_v58  ;;  %v126_v63 = vmul.f32 %v341_v60, %v110_v44  ;;  %v198_v6 = vpop.xlane.xlu0 %197  ;;  %v134_v23 = vmul.f32 %v130_v12, %v124_v56 }
  0xe2   :  { %v144_v1 = vadd.f32 %v140_v53, %v128_v61  ;;  %v136_v28 = vmul.f32 %v132_v15, %v128_v61  ;;  %v235_v29 = vmul.f32 0.00010986328, %v198_v6 }
  0xe3   :  { %v146_v2 = vadd.f32 1e-06, %v142_v62  ;;  %v143_v3 = vadd.f32 %v139_v0, %v126_v63  ;;  %v228_v7 = vpop.xlane.xlu1 %227  ;;  %v135_v32 = vmul.f32 %v131_v20, %v126_v63 }
  0xe4   :  { %v148_v4 = vadd.f32 1e-06, %v144_v1  ;;  %v238_v22 = vmul.f32 0.003125, %v228_v7 }
  0xe5   :  { %344 = vrcp.f32 %v146_v2  ;;  %v147_v8 = vadd.f32 1e-06, %v143_v3  ;;  %v226_v10 = vpop.xlane.xlu0 %225 }
  0xe6   :  { %346 = vrcp.f32 %v148_v4  ;;  %v237_v19 = vmul.f32 0.003125, %v226_v10  ;;  %v242_v37 = vadd.f32 %v238_v22, %v234_v21 }
  0xe7   :  { %348 = vrcp.f32 %v147_v8  ;;  %v230_v11 = vpop.xlane.xlu1 %229 }
  0xe8   :  { %v241_v33 = vadd.f32 %v237_v19, %v233_v18  ;;  %v239_v34 = vmul.f32 0.003125, %v230_v11 }
  0xe9   :  { %v200_v5 = vpop.xlane.xlu0 %199 }
  0xea   :  { %v236_v26 = vmul.f32 0.00010986328, %v200_v5  ;;  %v243_v45 = vadd.f32 %v239_v34, %v235_v29 }
  0xeb   :  { %v232_v16 = vpop.xlane.xlu1 %231 }
  0xec   :  { %v240_v25 = vmul.f32 0.003125, %v232_v16 }
  0xee   :  { %v343_v14 = vpop.eup %342  ;;  %v244_v41 = vadd.f32 %v240_v25, %v236_v26 }
  0xef   :  { %v150_v17 = vmul.f32 %v343_v14, %v133_v13 }
  0xf1   :  { %v245_v24 = vmul.f32 0.0140625, %v150_v17 }
  0xf2   :  { %v345_v27 = vpop.eup %344 }
  0xf3   :  { %v347_v30 = vpop.eup %346  ;;  %v152_v31 = vmul.f32 %v345_v27, %v134_v23  ;;  %v249_v40 = vsub.f32 %v241_v33, %v245_v24 }
  0xf4   :  { %v349_v35 = vpop.eup %348  ;;  %v156_v36 = vmul.f32 %v347_v30, %v136_v28 }
  0xf5   :  { %v246_v38 = vmul.f32 0.0140625, %v152_v31  ;;  %v154_v39 = vmul.f32 %v349_v35, %v135_v32  ;;  %v255_v48 = vsel %vm254_vm4, %v249_v40, 0.0 }
  0xf6   :  { %v248_v42 = vmul.f32 0.0140625, %v156_v36 }
  0xf7   :  { %v247_v43 = vmul.f32 0.0140625, %v154_v39  ;;  %v250_v44 = vsub.f32 %v242_v37, %v246_v38 }
  0xf8   :  { %v252_v47 = vsub.f32 %v244_v41, %v248_v42 }
  0xf9   :  { %v251_v46 = vsub.f32 %v243_v45, %v247_v43  ;;  %v256_v49 = vsel %vm254_vm4, %v250_v44, 0.0 }
  0xfa   :  { %v257_v50 = vadd.f32 %v256_v49, %v255_v48  ;;  %v260_v53 = vsel %vm254_vm4, %v252_v47, 0.0 }
  0xfb   :  { %v258_v51 = vsel %vm254_vm4, %v251_v46, 0.0 }
  0xfc   :  { %v259_v52 = vadd.f32 %v258_v51, %v257_v50 }
  0xfe   :  { %v261_v54 = vadd.f32 %v260_v53, %v259_v52 }
 0x100   :  { %262 = vadd.xlane.f32.xlu0 %v261_v54 }
 0x189   :  { %v263_v55 = vpop.xlane.xlu0 %262 }
 0x18a   :  { %v264_v56 = vrot.slane %v263_v55, 4 }
 0x18c   :  { %v265_v57 = vadd.f32 %v264_v56, %v263_v55 }
 0x18e   :  { %v266_v58 = vrot.slane %v265_v57, 2 }
 0x190   :  { %v267_v59 = vadd.f32 %v266_v58, %v265_v57 }
 0x192   :  { %v268_v60 = vrot.slane %v267_v59, 1 }
 0x194   :  { %v269_v61 = vadd.f32 %v268_v60, %v267_v59 }
 0x196   :  { %294 = vpush %v269_v61 }
 0x1c7   :  { %s295_s21 = spop %294 }
 0x1c8   :  { %v271_v62 = vstv %s295_s21 }
 0x1c9   :  { %273 = vst [vmem:[#allocation7] sm:$0xff] %v271_v62 }
 0x1ca   :  { %401 = shalt.err (!%p398_p0)
}
 0x1cb   :  { %283 = dma.vmem_to_hbm [thread:$0]  %s281_s1, 128, %s485_s2, [#allocation4]  }
 0x1cc   :  { %414 = dma.done.wait [#allocation4], 128  }
 0x1cd   :  { %415 = vsyncadd [#allocation4], 4294967168 }
 0x1ce   :  { %287 = vsyncpa [#allocation3], 1 }
 0x1cf   :  { %288 = vsyncpa [#allocation6], 1 }
 0x1d0   :  { %289 = vsyncpa [#allocation4], 1 }

</bundles_post_ra>
